<compile_context>
chip_gen: v5e
topology: v5e:2x2
jax: 0.10.0
libtpu: 0.0.40
codegen_flags: <defaults>
</compile_context>

<pallas_src>
import functools

import jax
import jax.numpy as jnp
from jax.experimental import pallas as pl
from jax.experimental.pallas import tpu as pltpu

# ---- hyper-parameters implied by the RSNN that uses NLPotential -------------
D_IN   = 4      # forward does inp.view(-1, 4)
HIDDEN = 32
D_OUT  = 8
T      = 20     # input expanded to 20 identical time steps
BETA   = 0.9    # hidden-LIF membrane decay
THRESH = 1.0    # spike threshold

# TODO(synk): only the output neuron (`NLPotential`) is given in the snippet;
# the hidden spiking neuron class is not, so a classic LIF (decay + threshold
# + subtractive reset, Heaviside spike) is used for the hidden layer.


# --------------------------- Pallas kernel ----------------------------------
def rsnn_kernel(P, inp_ref, w1_ref, w2_ref, out_ref):
    """P batch rows are packed per vector row; weights are block-diagonal."""
    PD_IN = P * D_IN
    PH    = P * HIDDEN

    # Slice the parameter slabs straight from the refs (all row offsets are
    # sublane-aligned), avoiding loads of the padding rows.
    w_in  = w1_ref[0:PD_IN, :]                 # (P*4,  P*32) block-diag
    w_rec = w1_ref[PD_IN:PD_IN + PH, :]        # (P*32, P*32) block-diag
    b_h   = w1_ref[PD_IN + PH:PD_IN + PH + 1, :]   # (1, P*32) tiled bias
    w_out = w2_ref[0:PH, :]                    # (P*32, P*8)  block-diag
    b_o   = w2_ref[PH:PH + 1, :]               # (1, P*8)     tiled bias

    inp0 = inp_ref[...]                        # (tm/P, P*4) packed batch rows

    # hoisted, loop-invariant input projection (bias folded in once)
    base = jnp.dot(inp0, w_in, preferred_element_type=jnp.float32) + b_h

    def lif_step(cur, mem):
        mem = BETA * mem + cur
        over = mem > THRESH
        spk = over.astype(jnp.float32)
        return spk, jnp.where(over, mem - THRESH, mem)   # subtractive reset

    def recur(spk):   # exactly one lane-dense dot per step on the chain
        return base + jnp.dot(spk, w_rec, preferred_element_type=jnp.float32)

    # t = 0: recurrent spikes are zero -> current is exactly `base`, and the
    #        resulting membrane is discarded at t=1 (quirk below), so only the
    #        spike decision matters.
    spk = (base > THRESH).astype(jnp.float32)

    # t = 1: the PyTorch loop still reads the ORIGINAL (empty) h, so LIF and
    #        readout states restart from zero while the t=0 spikes feed the
    #        recurrence.  (Reproduces the `h = new_h` placement quirk.)
    spk, lif_mem = lif_step(recur(spk), jnp.zeros_like(base))
    spk_acc = spk                     # NLPotential readout == plain spike sum

    # t = 2 .. T-1 : ordinary recurrence, fully unrolled (T is tiny & fixed)
    for _t in range(2, T):
        spk, lif_mem = lif_step(recur(spk), lif_mem)
        spk_acc = spk_acc + spk

    # NLPotential (non-leaky) readout, collapsed by linearity:
    #   mem_T = sum_{t=1..T-1} (spk_t @ w_out + b_o)
    #         = spk_acc @ w_out + (T-1) * b_o
    out_ref[...] = (jnp.dot(spk_acc, w_out, preferred_element_type=jnp.float32)
                    + jnp.float32(T - 1) * b_o)


# ------------------------------ wrapper --------------------------------------
def _round_up(x, m):
    return ((x + m - 1) // m) * m


def _device_info():
    """Heuristic (perf-only): pack width for the MXU + TensorCores per chip."""
    try:
        kind = jax.devices()[0].device_kind.lower()
    except Exception:
        kind = ""
    wide_mxu = ("v6" in kind) or ("v7" in kind) or ("7x" in kind)
    pack = 8 if wide_mxu else 4          # 256-lane packing on v6e/v7x, else 128
    dual_tc = ("v7" in kind) or ("7x" in kind) or ("v4" in kind) or ("v5p" in kind)
    cores = 2 if dual_tc else 1
    return pack, cores


def _block_diag(w, P):
    k, n = w.shape
    out = jnp.zeros((P * k, P * n), w.dtype)
    for j in range(P):
        out = out.at[j * k:(j + 1) * k, j * n:(j + 1) * n].set(w)
    return out


def pack_params(params, P):
    """Pack (w_in, w_rec, b_h, w_out, b_o) into two block-diagonal slabs."""
    w_in, w_rec, b_h, w_out, b_o = params
    PD_IN, PH, PD_OUT = P * D_IN, P * HIDDEN, P * D_OUT

    w_in_bd  = _block_diag(w_in.astype(jnp.float32),  P)   # (PD_IN, PH)
    w_rec_bd = _block_diag(w_rec.astype(jnp.float32), P)   # (PH, PH)
    w_out_bd = _block_diag(w_out.astype(jnp.float32), P)   # (PH, PD_OUT)
    b_h_t = jnp.tile(jnp.reshape(b_h, (1, HIDDEN)).astype(jnp.float32), (1, P))
    b_o_t = jnp.tile(jnp.reshape(b_o, (1, D_OUT)).astype(jnp.float32), (1, P))

    rows1 = PD_IN + PH + 8               # multiple of 8 for P in {4, 8}
    rows2 = PH + 8
    w1 = jnp.zeros((rows1, PH), jnp.float32)
    w1 = w1.at[0:PD_IN].set(w_in_bd)
    w1 = w1.at[PD_IN:PD_IN + PH].set(w_rec_bd)
    w1 = w1.at[PD_IN + PH].set(b_h_t[0])
    w2 = jnp.zeros((rows2, PD_OUT), jnp.float32)
    w2 = w2.at[0:PH].set(w_out_bd)
    w2 = w2.at[PH].set(b_o_t[0])
    return w1, w2


def rsnn_forward(inp, params, *, block_rows=1024, pack=None):
    """inp: any shape with size % 4 == 0 (PyTorch does inp.view(-1, 4))."""
    inp0 = jnp.reshape(inp, (-1, D_IN)).astype(jnp.float32)
    bsz = inp0.shape[0]

    P, cores = _device_info()
    if pack is not None:
        P = int(pack)
    unit = 8 * P                         # block rows must be a multiple of this

    bsz_pad = _round_up(bsz, unit)
    tm = min(_round_up(block_rows, unit), bsz_pad)
    # dual-TensorCore chips: prefer >= `cores` parallel blocks when possible
    if cores > 1 and bsz_pad >= cores * unit:
        tm = min(tm, max(unit, (bsz_pad // cores) // unit * unit))
    padded = _round_up(bsz, tm)
    if padded != bsz:
        inp0 = jnp.pad(inp0, ((0, padded - bsz), (0, 0)))
    n_blocks = padded // tm

    w1, w2 = pack_params(params, P)
    rows1, ph = w1.shape
    rows2, pd_out = w2.shape

    # pack P batch rows per vector row (row-major reshape = block-diag layout)
    inp_packed = jnp.reshape(inp0, (padded // P, P * D_IN))

    out_packed = pl.pallas_call(
        functools.partial(rsnn_kernel, P),
        out_shape=jax.ShapeDtypeStruct((padded // P, P * D_OUT), jnp.float32),
        grid=(n_blocks,),
        in_specs=[
            pl.BlockSpec((tm // P, P * D_IN), lambda i: (i, 0)),
            pl.BlockSpec((rows1, ph), lambda i: (0, 0)),
            pl.BlockSpec((rows2, pd_out), lambda i: (0, 0)),
        ],
        out_specs=pl.BlockSpec((tm // P, P * D_OUT), lambda i: (i, 0)),
        compiler_params=pltpu.CompilerParams(
            dimension_semantics=("parallel",),
            vmem_limit_bytes=32 * 1024 * 1024),
    )(inp_packed, w1, w2)

    return jnp.reshape(out_packed, (padded, D_OUT))[:bsz]


def init_params(key):
    """Deterministic init mimicking nn.Linear's U(-1/sqrt(fan_in), 1/sqrt(fan_in))."""
    k1, k2, k3, k4 = jax.random.split(key, 4)
    fan_main = D_IN + HIDDEN
    bm = 1.0 / jnp.sqrt(fan_main)
    w_main = jax.random.uniform(k1, (HIDDEN, fan_main), jnp.float32, -bm, bm)
    b_main = jax.random.uniform(k2, (HIDDEN,), jnp.float32, -bm, bm)
    bo = 1.0 / jnp.sqrt(HIDDEN)
    w_outp = jax.random.uniform(k3, (D_OUT, HIDDEN), jnp.float32, -bo, bo)
    b_outp = jax.random.uniform(k4, (D_OUT,), jnp.float32, -bo, bo)
    w_t = w_main.T                                  # (D_IN+HIDDEN, HIDDEN)
    return (w_t[:D_IN], w_t[D_IN:], b_main.reshape(1, HIDDEN),
            w_outp.T, b_outp.reshape(1, D_OUT))


# --------------------- pure-JAX reference (literal port) --------------------
def rsnn_reference(inp, params):
    w_in, w_rec, b_h, w_out, b_o = params
    w_main_t = jnp.concatenate([w_in, w_rec], axis=0)
    inp0 = jnp.reshape(inp, (-1, D_IN)).astype(jnp.float32)
    bsz = inp0.shape[0]

    def lif(x, state):
        mem = jnp.zeros_like(x) if state is None else state["mem"]
        mem = BETA * mem + x
        spk = (mem > THRESH).astype(jnp.float32)
        return spk, {"mem": mem - spk * THRESH}

    def nl_potential(x, state):
        # literal port of NLPotential.forward
        h = state or {"mem": jnp.zeros_like(x)}
        new_h = {}
        new_h["mem"] = h["mem"] + x
        return new_h

    h, new_h = {}, {}
    x = jnp.concatenate([inp0, jnp.zeros((bsz, HIDDEN), jnp.float32)], axis=1)
    x = x @ w_main_t + b_h
    x, new_h["lif"] = lif(x, h.get("lif"))
    o = x @ w_out + b_o
    new_h["out"] = nl_potential(o, h.get("out"))
    for _t in range(1, T):
        xc = jnp.concatenate([inp0, x], axis=1)
        cur = xc @ w_main_t + b_h
        x, new_h["lif"] = lif(cur, h.get("lif"))
        o = x @ w_out + b_o
        new_h["out"] = nl_potential(o, h.get("out"))
        h = new_h               # note: end-of-body placement (the quirk)
    return new_h["out"]["mem"]


if __name__ == "__main__":
    key = jax.random.PRNGKey(0)
    kx1, kx2, kp = jax.random.split(key, 3)
    params = init_params(kp)

    # --- baseline small tests against the literal reference ---
    x1 = jax.random.normal(kx1, (2, 16), jnp.float32)   # view(-1,4) -> (8, 4)
    x2 = jax.random.normal(kx2, (3, 16), jnp.float32)   # view(-1,4) -> (12, 4)
    ref1 = rsnn_reference(x1, params)
    ref2 = rsnn_reference(x2, params)

    for x, ref in ((x1, ref1), (x2, ref2)):
        out = jax.block_until_ready(rsnn_forward(x, params))
        assert out.shape == ref.shape, out.shape
        assert bool(jnp.all(jnp.isfinite(out)))
        assert bool(jnp.allclose(out, ref, rtol=1e-3, atol=1e-3)), (out, ref)

    # --- both pack factors (128- and 256-lane block-diag paths) ---
    for pk in (4, 8):
        out = jax.block_until_ready(rsnn_forward(x1, params, pack=pk))
        assert bool(jnp.allclose(out, ref1, rtol=1e-3, atol=1e-3)), pk

    # --- larger batch: exercises multi-block grid + batch-row padding.
    # Rows are duplicates of already-validated rows (row results are
    # independent of batch composition), so compare against the tiled ref.
    reps = 36                                    # 288 rows, not a multiple of 64
    x_big = jnp.tile(jnp.reshape(x1, (-1, D_IN)), (reps, 1))
    ref_big = jnp.tile(ref1, (reps, 1))
    out_big = jax.block_until_ready(rsnn_forward(x_big, params, block_rows=1024))
    assert out_big.shape == ref_big.shape
    assert bool(jnp.all(jnp.isfinite(out_big)))
    assert bool(jnp.allclose(out_big, ref_big, rtol=1e-3, atol=1e-3))

    print("KERNEL_OK")
</pallas_src>

<mosaic_0001>
module attributes {stable_mosaic.version = 11 : i64} {
  func.func @rsnn_kernel(%arg0: i32, %arg1: memref<8x16xf32, #tpu.memory_space<vmem>>, %arg2: memref<152x128xf32, #tpu.memory_space<vmem>>, %arg3: memref<136x32xf32, #tpu.memory_space<vmem>>, %arg4: memref<8x32xf32, #tpu.memory_space<vmem>>) attributes {dimension_semantics = [#tpu.dimension_semantics<parallel>], iteration_bounds = array<i64: 1>, scalar_prefetch = 0 : i64, scratch_operands = 0 : i64, tpu.core_type = #tpu.core_type<tc>, window_params = [{transform_indices = @transform_0, window_bounds = array<i64: 8, 16>}, {pipeline_mode = #tpu.pipeline_mode<synchronous>, transform_indices = @transform_1, window_bounds = array<i64: 152, 128>}, {pipeline_mode = #tpu.pipeline_mode<synchronous>, transform_indices = @transform_2, window_bounds = array<i64: 136, 32>}, {transform_indices = @transform_3, window_bounds = array<i64: 8, 32>}]} {
    %c0 = arith.constant 0 : index
    %c0_0 = arith.constant 0 : index
    %0 = vector.load %arg2[%c0, %c0_0] : memref<152x128xf32, #tpu.memory_space<vmem>>, vector<16x128xf32>
    %c16 = arith.constant 16 : index
    %c0_1 = arith.constant 0 : index
    %1 = vector.load %arg2[%c16, %c0_1] : memref<152x128xf32, #tpu.memory_space<vmem>>, vector<128x128xf32>
    %c144 = arith.constant 144 : index
    %c0_2 = arith.constant 0 : index
    %2 = vector.load %arg2[%c144, %c0_2] : memref<152x128xf32, #tpu.memory_space<vmem>>, vector<1x128xf32>
    %c0_3 = arith.constant 0 : index
    %c0_4 = arith.constant 0 : index
    %3 = vector.load %arg3[%c0_3, %c0_4] : memref<136x32xf32, #tpu.memory_space<vmem>>, vector<128x32xf32>
    %c128 = arith.constant 128 : index
    %c0_5 = arith.constant 0 : index
    %4 = vector.load %arg3[%c128, %c0_5] : memref<136x32xf32, #tpu.memory_space<vmem>>, vector<1x32xf32>
    %c0_6 = arith.constant 0 : index
    %c0_7 = arith.constant 0 : index
    %5 = vector.load %arg1[%c0_6, %c0_7] : memref<8x16xf32, #tpu.memory_space<vmem>>, vector<8x16xf32>
    %cst = arith.constant dense<0.000000e+00> : vector<8x128xf32>
    %6 = tpu.matmul %5, %0, %cst {dimension_numbers = #tpu.dot_dimension_numbers<[1], [0], [0], [1], [0, 0, 1, 1], [], []>} : vector<8x16xf32>, vector<16x128xf32>, vector<8x128xf32> -> vector<8x128xf32>
    %7 = vector.broadcast %2 : vector<1x128xf32> to vector<8x128xf32>
    %8 = arith.addf %6, %7 : vector<8x128xf32>
    %cst_8 = arith.constant 1.000000e+00 : f32
    %9 = vector.broadcast %cst_8 : f32 to vector<8x128xf32>
    %10 = arith.cmpf ogt, %8, %9 : vector<8x128xf32>
    %11 = arith.extui %10 : vector<8x128xi1> to vector<8x128xi32>
    %12 = arith.sitofp %11 : vector<8x128xi32> to vector<8x128xf32>
    %cst_9 = arith.constant dense<0.000000e+00> : vector<8x128xf32>
    %13 = tpu.matmul %12, %1, %cst_9 {dimension_numbers = #tpu.dot_dimension_numbers<[1], [0], [0], [1], [0, 0, 1, 1], [], []>} : vector<8x128xf32>, vector<128x128xf32>, vector<8x128xf32> -> vector<8x128xf32>
    %14 = arith.addf %8, %13 : vector<8x128xf32>
    %cst_10 = arith.constant 0.000000e+00 : f32
    %15 = vector.broadcast %cst_10 : f32 to vector<8x128xf32>
    %cst_11 = arith.constant 0.899999976 : f32
    %16 = vector.broadcast %cst_11 : f32 to vector<8x128xf32>
    %17 = arith.mulf %16, %15 : vector<8x128xf32>
    %18 = arith.addf %17, %14 : vector<8x128xf32>
    %cst_12 = arith.constant 1.000000e+00 : f32
    %19 = vector.broadcast %cst_12 : f32 to vector<8x128xf32>
    %20 = arith.cmpf ogt, %18, %19 : vector<8x128xf32>
    %21 = arith.extui %20 : vector<8x128xi1> to vector<8x128xi32>
    %22 = arith.sitofp %21 : vector<8x128xi32> to vector<8x128xf32>
    %cst_13 = arith.constant 1.000000e+00 : f32
    %23 = vector.broadcast %cst_13 : f32 to vector<8x128xf32>
    %24 = arith.subf %18, %23 : vector<8x128xf32>
    %25 = arith.select %20, %24, %18 : vector<8x128xi1>, vector<8x128xf32>
    %cst_14 = arith.constant dense<0.000000e+00> : vector<8x128xf32>
    %26 = tpu.matmul %22, %1, %cst_14 {dimension_numbers = #tpu.dot_dimension_numbers<[1], [0], [0], [1], [0, 0, 1, 1], [], []>} : vector<8x128xf32>, vector<128x128xf32>, vector<8x128xf32> -> vector<8x128xf32>
    %27 = arith.addf %8, %26 : vector<8x128xf32>
    %cst_15 = arith.constant 0.899999976 : f32
    %28 = vector.broadcast %cst_15 : f32 to vector<8x128xf32>
    %29 = arith.mulf %28, %25 : vector<8x128xf32>
    %30 = arith.addf %29, %27 : vector<8x128xf32>
    %cst_16 = arith.constant 1.000000e+00 : f32
    %31 = vector.broadcast %cst_16 : f32 to vector<8x128xf32>
    %32 = arith.cmpf ogt, %30, %31 : vector<8x128xf32>
    %33 = arith.extui %32 : vector<8x128xi1> to vector<8x128xi32>
    %34 = arith.sitofp %33 : vector<8x128xi32> to vector<8x128xf32>
    %cst_17 = arith.constant 1.000000e+00 : f32
    %35 = vector.broadcast %cst_17 : f32 to vector<8x128xf32>
    %36 = arith.subf %30, %35 : vector<8x128xf32>
    %37 = arith.select %32, %36, %30 : vector<8x128xi1>, vector<8x128xf32>
    %38 = arith.addf %22, %34 : vector<8x128xf32>
    %cst_18 = arith.constant dense<0.000000e+00> : vector<8x128xf32>
    %39 = tpu.matmul %34, %1, %cst_18 {dimension_numbers = #tpu.dot_dimension_numbers<[1], [0], [0], [1], [0, 0, 1, 1], [], []>} : vector<8x128xf32>, vector<128x128xf32>, vector<8x128xf32> -> vector<8x128xf32>
    %40 = arith.addf %8, %39 : vector<8x128xf32>
    %cst_19 = arith.constant 0.899999976 : f32
    %41 = vector.broadcast %cst_19 : f32 to vector<8x128xf32>
    %42 = arith.mulf %41, %37 : vector<8x128xf32>
    %43 = arith.addf %42, %40 : vector<8x128xf32>
    %cst_20 = arith.constant 1.000000e+00 : f32
    %44 = vector.broadcast %cst_20 : f32 to vector<8x128xf32>
    %45 = arith.cmpf ogt, %43, %44 : vector<8x128xf32>
    %46 = arith.extui %45 : vector<8x128xi1> to vector<8x128xi32>
    %47 = arith.sitofp %46 : vector<8x128xi32> to vector<8x128xf32>
    %cst_21 = arith.constant 1.000000e+00 : f32
    %48 = vector.broadcast %cst_21 : f32 to vector<8x128xf32>
    %49 = arith.subf %43, %48 : vector<8x128xf32>
    %50 = arith.select %45, %49, %43 : vector<8x128xi1>, vector<8x128xf32>
    %51 = arith.addf %38, %47 : vector<8x128xf32>
    %cst_22 = arith.constant dense<0.000000e+00> : vector<8x128xf32>
    %52 = tpu.matmul %47, %1, %cst_22 {dimension_numbers = #tpu.dot_dimension_numbers<[1], [0], [0], [1], [0, 0, 1, 1], [], []>} : vector<8x128xf32>, vector<128x128xf32>, vector<8x128xf32> -> vector<8x128xf32>
    %53 = arith.addf %8, %52 : vector<8x128xf32>
    %cst_23 = arith.constant 0.899999976 : f32
    %54 = vector.broadcast %cst_23 : f32 to vector<8x128xf32>
    %55 = arith.mulf %54, %50 : vector<8x128xf32>
    %56 = arith.addf %55, %53 : vector<8x128xf32>
    %cst_24 = arith.constant 1.000000e+00 : f32
    %57 = vector.broadcast %cst_24 : f32 to vector<8x128xf32>
    %58 = arith.cmpf ogt, %56, %57 : vector<8x128xf32>
    %59 = arith.extui %58 : vector<8x128xi1> to vector<8x128xi32>
    %60 = arith.sitofp %59 : vector<8x128xi32> to vector<8x128xf32>
    %cst_25 = arith.constant 1.000000e+00 : f32
    %61 = vector.broadcast %cst_25 : f32 to vector<8x128xf32>
    %62 = arith.subf %56, %61 : vector<8x128xf32>
    %63 = arith.select %58, %62, %56 : vector<8x128xi1>, vector<8x128xf32>
    %64 = arith.addf %51, %60 : vector<8x128xf32>
    %cst_26 = arith.constant dense<0.000000e+00> : vector<8x128xf32>
    %65 = tpu.matmul %60, %1, %cst_26 {dimension_numbers = #tpu.dot_dimension_numbers<[1], [0], [0], [1], [0, 0, 1, 1], [], []>} : vector<8x128xf32>, vector<128x128xf32>, vector<8x128xf32> -> vector<8x128xf32>
    %66 = arith.addf %8, %65 : vector<8x128xf32>
    %cst_27 = arith.constant 0.899999976 : f32
    %67 = vector.broadcast %cst_27 : f32 to vector<8x128xf32>
    %68 = arith.mulf %67, %63 : vector<8x128xf32>
    %69 = arith.addf %68, %66 : vector<8x128xf32>
    %cst_28 = arith.constant 1.000000e+00 : f32
    %70 = vector.broadcast %cst_28 : f32 to vector<8x128xf32>
    %71 = arith.cmpf ogt, %69, %70 : vector<8x128xf32>
    %72 = arith.extui %71 : vector<8x128xi1> to vector<8x128xi32>
    %73 = arith.sitofp %72 : vector<8x128xi32> to vector<8x128xf32>
    %cst_29 = arith.constant 1.000000e+00 : f32
    %74 = vector.broadcast %cst_29 : f32 to vector<8x128xf32>
    %75 = arith.subf %69, %74 : vector<8x128xf32>
    %76 = arith.select %71, %75, %69 : vector<8x128xi1>, vector<8x128xf32>
    %77 = arith.addf %64, %73 : vector<8x128xf32>
    %cst_30 = arith.constant dense<0.000000e+00> : vector<8x128xf32>
    %78 = tpu.matmul %73, %1, %cst_30 {dimension_numbers = #tpu.dot_dimension_numbers<[1], [0], [0], [1], [0, 0, 1, 1], [], []>} : vector<8x128xf32>, vector<128x128xf32>, vector<8x128xf32> -> vector<8x128xf32>
    %79 = arith.addf %8, %78 : vector<8x128xf32>
    %cst_31 = arith.constant 0.899999976 : f32
    %80 = vector.broadcast %cst_31 : f32 to vector<8x128xf32>
    %81 = arith.mulf %80, %76 : vector<8x128xf32>
    %82 = arith.addf %81, %79 : vector<8x128xf32>
    %cst_32 = arith.constant 1.000000e+00 : f32
    %83 = vector.broadcast %cst_32 : f32 to vector<8x128xf32>
    %84 = arith.cmpf ogt, %82, %83 : vector<8x128xf32>
    %85 = arith.extui %84 : vector<8x128xi1> to vector<8x128xi32>
    %86 = arith.sitofp %85 : vector<8x128xi32> to vector<8x128xf32>
    %cst_33 = arith.constant 1.000000e+00 : f32
    %87 = vector.broadcast %cst_33 : f32 to vector<8x128xf32>
    %88 = arith.subf %82, %87 : vector<8x128xf32>
    %89 = arith.select %84, %88, %82 : vector<8x128xi1>, vector<8x128xf32>
    %90 = arith.addf %77, %86 : vector<8x128xf32>
    %cst_34 = arith.constant dense<0.000000e+00> : vector<8x128xf32>
    %91 = tpu.matmul %86, %1, %cst_34 {dimension_numbers = #tpu.dot_dimension_numbers<[1], [0], [0], [1], [0, 0, 1, 1], [], []>} : vector<8x128xf32>, vector<128x128xf32>, vector<8x128xf32> -> vector<8x128xf32>
    %92 = arith.addf %8, %91 : vector<8x128xf32>
    %cst_35 = arith.constant 0.899999976 : f32
    %93 = vector.broadcast %cst_35 : f32 to vector<8x128xf32>
    %94 = arith.mulf %93, %89 : vector<8x128xf32>
    %95 = arith.addf %94, %92 : vector<8x128xf32>
    %cst_36 = arith.constant 1.000000e+00 : f32
    %96 = vector.broadcast %cst_36 : f32 to vector<8x128xf32>
    %97 = arith.cmpf ogt, %95, %96 : vector<8x128xf32>
    %98 = arith.extui %97 : vector<8x128xi1> to vector<8x128xi32>
    %99 = arith.sitofp %98 : vector<8x128xi32> to vector<8x128xf32>
    %cst_37 = arith.constant 1.000000e+00 : f32
    %100 = vector.broadcast %cst_37 : f32 to vector<8x128xf32>
    %101 = arith.subf %95, %100 : vector<8x128xf32>
    %102 = arith.select %97, %101, %95 : vector<8x128xi1>, vector<8x128xf32>
    %103 = arith.addf %90, %99 : vector<8x128xf32>
    %cst_38 = arith.constant dense<0.000000e+00> : vector<8x128xf32>
    %104 = tpu.matmul %99, %1, %cst_38 {dimension_numbers = #tpu.dot_dimension_numbers<[1], [0], [0], [1], [0, 0, 1, 1], [], []>} : vector<8x128xf32>, vector<128x128xf32>, vector<8x128xf32> -> vector<8x128xf32>
    %105 = arith.addf %8, %104 : vector<8x128xf32>
    %cst_39 = arith.constant 0.899999976 : f32
    %106 = vector.broadcast %cst_39 : f32 to vector<8x128xf32>
    %107 = arith.mulf %106, %102 : vector<8x128xf32>
    %108 = arith.addf %107, %105 : vector<8x128xf32>
    %cst_40 = arith.constant 1.000000e+00 : f32
    %109 = vector.broadcast %cst_40 : f32 to vector<8x128xf32>
    %110 = arith.cmpf ogt, %108, %109 : vector<8x128xf32>
    %111 = arith.extui %110 : vector<8x128xi1> to vector<8x128xi32>
    %112 = arith.sitofp %111 : vector<8x128xi32> to vector<8x128xf32>
    %cst_41 = arith.constant 1.000000e+00 : f32
    %113 = vector.broadcast %cst_41 : f32 to vector<8x128xf32>
    %114 = arith.subf %108, %113 : vector<8x128xf32>
    %115 = arith.select %110, %114, %108 : vector<8x128xi1>, vector<8x128xf32>
    %116 = arith.addf %103, %112 : vector<8x128xf32>
    %cst_42 = arith.constant dense<0.000000e+00> : vector<8x128xf32>
    %117 = tpu.matmul %112, %1, %cst_42 {dimension_numbers = #tpu.dot_dimension_numbers<[1], [0], [0], [1], [0, 0, 1, 1], [], []>} : vector<8x128xf32>, vector<128x128xf32>, vector<8x128xf32> -> vector<8x128xf32>
    %118 = arith.addf %8, %117 : vector<8x128xf32>
    %cst_43 = arith.constant 0.899999976 : f32
    %119 = vector.broadcast %cst_43 : f32 to vector<8x128xf32>
    %120 = arith.mulf %119, %115 : vector<8x128xf32>
    %121 = arith.addf %120, %118 : vector<8x128xf32>
    %cst_44 = arith.constant 1.000000e+00 : f32
    %122 = vector.broadcast %cst_44 : f32 to vector<8x128xf32>
    %123 = arith.cmpf ogt, %121, %122 : vector<8x128xf32>
    %124 = arith.extui %123 : vector<8x128xi1> to vector<8x128xi32>
    %125 = arith.sitofp %124 : vector<8x128xi32> to vector<8x128xf32>
    %cst_45 = arith.constant 1.000000e+00 : f32
    %126 = vector.broadcast %cst_45 : f32 to vector<8x128xf32>
    %127 = arith.subf %121, %126 : vector<8x128xf32>
    %128 = arith.select %123, %127, %121 : vector<8x128xi1>, vector<8x128xf32>
    %129 = arith.addf %116, %125 : vector<8x128xf32>
    %cst_46 = arith.constant dense<0.000000e+00> : vector<8x128xf32>
    %130 = tpu.matmul %125, %1, %cst_46 {dimension_numbers = #tpu.dot_dimension_numbers<[1], [0], [0], [1], [0, 0, 1, 1], [], []>} : vector<8x128xf32>, vector<128x128xf32>, vector<8x128xf32> -> vector<8x128xf32>
    %131 = arith.addf %8, %130 : vector<8x128xf32>
    %cst_47 = arith.constant 0.899999976 : f32
    %132 = vector.broadcast %cst_47 : f32 to vector<8x128xf32>
    %133 = arith.mulf %132, %128 : vector<8x128xf32>
    %134 = arith.addf %133, %131 : vector<8x128xf32>
    %cst_48 = arith.constant 1.000000e+00 : f32
    %135 = vector.broadcast %cst_48 : f32 to vector<8x128xf32>
    %136 = arith.cmpf ogt, %134, %135 : vector<8x128xf32>
    %137 = arith.extui %136 : vector<8x128xi1> to vector<8x128xi32>
    %138 = arith.sitofp %137 : vector<8x128xi32> to vector<8x128xf32>
    %cst_49 = arith.constant 1.000000e+00 : f32
    %139 = vector.broadcast %cst_49 : f32 to vector<8x128xf32>
    %140 = arith.subf %134, %139 : vector<8x128xf32>
    %141 = arith.select %136, %140, %134 : vector<8x128xi1>, vector<8x128xf32>
    %142 = arith.addf %129, %138 : vector<8x128xf32>
    %cst_50 = arith.constant dense<0.000000e+00> : vector<8x128xf32>
    %143 = tpu.matmul %138, %1, %cst_50 {dimension_numbers = #tpu.dot_dimension_numbers<[1], [0], [0], [1], [0, 0, 1, 1], [], []>} : vector<8x128xf32>, vector<128x128xf32>, vector<8x128xf32> -> vector<8x128xf32>
    %144 = arith.addf %8, %143 : vector<8x128xf32>
    %cst_51 = arith.constant 0.899999976 : f32
    %145 = vector.broadcast %cst_51 : f32 to vector<8x128xf32>
    %146 = arith.mulf %145, %141 : vector<8x128xf32>
    %147 = arith.addf %146, %144 : vector<8x128xf32>
    %cst_52 = arith.constant 1.000000e+00 : f32
    %148 = vector.broadcast %cst_52 : f32 to vector<8x128xf32>
    %149 = arith.cmpf ogt, %147, %148 : vector<8x128xf32>
    %150 = arith.extui %149 : vector<8x128xi1> to vector<8x128xi32>
    %151 = arith.sitofp %150 : vector<8x128xi32> to vector<8x128xf32>
    %cst_53 = arith.constant 1.000000e+00 : f32
    %152 = vector.broadcast %cst_53 : f32 to vector<8x128xf32>
    %153 = arith.subf %147, %152 : vector<8x128xf32>
    %154 = arith.select %149, %153, %147 : vector<8x128xi1>, vector<8x128xf32>
    %155 = arith.addf %142, %151 : vector<8x128xf32>
    %cst_54 = arith.constant dense<0.000000e+00> : vector<8x128xf32>
    %156 = tpu.matmul %151, %1, %cst_54 {dimension_numbers = #tpu.dot_dimension_numbers<[1], [0], [0], [1], [0, 0, 1, 1], [], []>} : vector<8x128xf32>, vector<128x128xf32>, vector<8x128xf32> -> vector<8x128xf32>
    %157 = arith.addf %8, %156 : vector<8x128xf32>
    %cst_55 = arith.constant 0.899999976 : f32
    %158 = vector.broadcast %cst_55 : f32 to vector<8x128xf32>
    %159 = arith.mulf %158, %154 : vector<8x128xf32>
    %160 = arith.addf %159, %157 : vector<8x128xf32>
    %cst_56 = arith.constant 1.000000e+00 : f32
    %161 = vector.broadcast %cst_56 : f32 to vector<8x128xf32>
    %162 = arith.cmpf ogt, %160, %161 : vector<8x128xf32>
    %163 = arith.extui %162 : vector<8x128xi1> to vector<8x128xi32>
    %164 = arith.sitofp %163 : vector<8x128xi32> to vector<8x128xf32>
    %cst_57 = arith.constant 1.000000e+00 : f32
    %165 = vector.broadcast %cst_57 : f32 to vector<8x128xf32>
    %166 = arith.subf %160, %165 : vector<8x128xf32>
    %167 = arith.select %162, %166, %160 : vector<8x128xi1>, vector<8x128xf32>
    %168 = arith.addf %155, %164 : vector<8x128xf32>
    %cst_58 = arith.constant dense<0.000000e+00> : vector<8x128xf32>
    %169 = tpu.matmul %164, %1, %cst_58 {dimension_numbers = #tpu.dot_dimension_numbers<[1], [0], [0], [1], [0, 0, 1, 1], [], []>} : vector<8x128xf32>, vector<128x128xf32>, vector<8x128xf32> -> vector<8x128xf32>
    %170 = arith.addf %8, %169 : vector<8x128xf32>
    %cst_59 = arith.constant 0.899999976 : f32
    %171 = vector.broadcast %cst_59 : f32 to vector<8x128xf32>
    %172 = arith.mulf %171, %167 : vector<8x128xf32>
    %173 = arith.addf %172, %170 : vector<8x128xf32>
    %cst_60 = arith.constant 1.000000e+00 : f32
    %174 = vector.broadcast %cst_60 : f32 to vector<8x128xf32>
    %175 = arith.cmpf ogt, %173, %174 : vector<8x128xf32>
    %176 = arith.extui %175 : vector<8x128xi1> to vector<8x128xi32>
    %177 = arith.sitofp %176 : vector<8x128xi32> to vector<8x128xf32>
    %cst_61 = arith.constant 1.000000e+00 : f32
    %178 = vector.broadcast %cst_61 : f32 to vector<8x128xf32>
    %179 = arith.subf %173, %178 : vector<8x128xf32>
    %180 = arith.select %175, %179, %173 : vector<8x128xi1>, vector<8x128xf32>
    %181 = arith.addf %168, %177 : vector<8x128xf32>
    %cst_62 = arith.constant dense<0.000000e+00> : vector<8x128xf32>
    %182 = tpu.matmul %177, %1, %cst_62 {dimension_numbers = #tpu.dot_dimension_numbers<[1], [0], [0], [1], [0, 0, 1, 1], [], []>} : vector<8x128xf32>, vector<128x128xf32>, vector<8x128xf32> -> vector<8x128xf32>
    %183 = arith.addf %8, %182 : vector<8x128xf32>
    %cst_63 = arith.constant 0.899999976 : f32
    %184 = vector.broadcast %cst_63 : f32 to vector<8x128xf32>
    %185 = arith.mulf %184, %180 : vector<8x128xf32>
    %186 = arith.addf %185, %183 : vector<8x128xf32>
    %cst_64 = arith.constant 1.000000e+00 : f32
    %187 = vector.broadcast %cst_64 : f32 to vector<8x128xf32>
    %188 = arith.cmpf ogt, %186, %187 : vector<8x128xf32>
    %189 = arith.extui %188 : vector<8x128xi1> to vector<8x128xi32>
    %190 = arith.sitofp %189 : vector<8x128xi32> to vector<8x128xf32>
    %cst_65 = arith.constant 1.000000e+00 : f32
    %191 = vector.broadcast %cst_65 : f32 to vector<8x128xf32>
    %192 = arith.subf %186, %191 : vector<8x128xf32>
    %193 = arith.select %188, %192, %186 : vector<8x128xi1>, vector<8x128xf32>
    %194 = arith.addf %181, %190 : vector<8x128xf32>
    %cst_66 = arith.constant dense<0.000000e+00> : vector<8x128xf32>
    %195 = tpu.matmul %190, %1, %cst_66 {dimension_numbers = #tpu.dot_dimension_numbers<[1], [0], [0], [1], [0, 0, 1, 1], [], []>} : vector<8x128xf32>, vector<128x128xf32>, vector<8x128xf32> -> vector<8x128xf32>
    %196 = arith.addf %8, %195 : vector<8x128xf32>
    %cst_67 = arith.constant 0.899999976 : f32
    %197 = vector.broadcast %cst_67 : f32 to vector<8x128xf32>
    %198 = arith.mulf %197, %193 : vector<8x128xf32>
    %199 = arith.addf %198, %196 : vector<8x128xf32>
    %cst_68 = arith.constant 1.000000e+00 : f32
    %200 = vector.broadcast %cst_68 : f32 to vector<8x128xf32>
    %201 = arith.cmpf ogt, %199, %200 : vector<8x128xf32>
    %202 = arith.extui %201 : vector<8x128xi1> to vector<8x128xi32>
    %203 = arith.sitofp %202 : vector<8x128xi32> to vector<8x128xf32>
    %cst_69 = arith.constant 1.000000e+00 : f32
    %204 = vector.broadcast %cst_69 : f32 to vector<8x128xf32>
    %205 = arith.subf %199, %204 : vector<8x128xf32>
    %206 = arith.select %201, %205, %199 : vector<8x128xi1>, vector<8x128xf32>
    %207 = arith.addf %194, %203 : vector<8x128xf32>
    %cst_70 = arith.constant dense<0.000000e+00> : vector<8x128xf32>
    %208 = tpu.matmul %203, %1, %cst_70 {dimension_numbers = #tpu.dot_dimension_numbers<[1], [0], [0], [1], [0, 0, 1, 1], [], []>} : vector<8x128xf32>, vector<128x128xf32>, vector<8x128xf32> -> vector<8x128xf32>
    %209 = arith.addf %8, %208 : vector<8x128xf32>
    %cst_71 = arith.constant 0.899999976 : f32
    %210 = vector.broadcast %cst_71 : f32 to vector<8x128xf32>
    %211 = arith.mulf %210, %206 : vector<8x128xf32>
    %212 = arith.addf %211, %209 : vector<8x128xf32>
    %cst_72 = arith.constant 1.000000e+00 : f32
    %213 = vector.broadcast %cst_72 : f32 to vector<8x128xf32>
    %214 = arith.cmpf ogt, %212, %213 : vector<8x128xf32>
    %215 = arith.extui %214 : vector<8x128xi1> to vector<8x128xi32>
    %216 = arith.sitofp %215 : vector<8x128xi32> to vector<8x128xf32>
    %cst_73 = arith.constant 1.000000e+00 : f32
    %217 = vector.broadcast %cst_73 : f32 to vector<8x128xf32>
    %218 = arith.subf %212, %217 : vector<8x128xf32>
    %219 = arith.select %214, %218, %212 : vector<8x128xi1>, vector<8x128xf32>
    %220 = arith.addf %207, %216 : vector<8x128xf32>
    %cst_74 = arith.constant dense<0.000000e+00> : vector<8x128xf32>
    %221 = tpu.matmul %216, %1, %cst_74 {dimension_numbers = #tpu.dot_dimension_numbers<[1], [0], [0], [1], [0, 0, 1, 1], [], []>} : vector<8x128xf32>, vector<128x128xf32>, vector<8x128xf32> -> vector<8x128xf32>
    %222 = arith.addf %8, %221 : vector<8x128xf32>
    %cst_75 = arith.constant 0.899999976 : f32
    %223 = vector.broadcast %cst_75 : f32 to vector<8x128xf32>
    %224 = arith.mulf %223, %219 : vector<8x128xf32>
    %225 = arith.addf %224, %222 : vector<8x128xf32>
    %cst_76 = arith.constant 1.000000e+00 : f32
    %226 = vector.broadcast %cst_76 : f32 to vector<8x128xf32>
    %227 = arith.cmpf ogt, %225, %226 : vector<8x128xf32>
    %228 = arith.extui %227 : vector<8x128xi1> to vector<8x128xi32>
    %229 = arith.sitofp %228 : vector<8x128xi32> to vector<8x128xf32>
    %cst_77 = arith.constant 1.000000e+00 : f32
    %230 = vector.broadcast %cst_77 : f32 to vector<8x128xf32>
    %231 = arith.subf %225, %230 : vector<8x128xf32>
    %232 = arith.select %227, %231, %225 : vector<8x128xi1>, vector<8x128xf32>
    %233 = arith.addf %220, %229 : vector<8x128xf32>
    %cst_78 = arith.constant dense<0.000000e+00> : vector<8x128xf32>
    %234 = tpu.matmul %229, %1, %cst_78 {dimension_numbers = #tpu.dot_dimension_numbers<[1], [0], [0], [1], [0, 0, 1, 1], [], []>} : vector<8x128xf32>, vector<128x128xf32>, vector<8x128xf32> -> vector<8x128xf32>
    %235 = arith.addf %8, %234 : vector<8x128xf32>
    %cst_79 = arith.constant 0.899999976 : f32
    %236 = vector.broadcast %cst_79 : f32 to vector<8x128xf32>
    %237 = arith.mulf %236, %232 : vector<8x128xf32>
    %238 = arith.addf %237, %235 : vector<8x128xf32>
    %cst_80 = arith.constant 1.000000e+00 : f32
    %239 = vector.broadcast %cst_80 : f32 to vector<8x128xf32>
    %240 = arith.cmpf ogt, %238, %239 : vector<8x128xf32>
    %241 = arith.extui %240 : vector<8x128xi1> to vector<8x128xi32>
    %242 = arith.sitofp %241 : vector<8x128xi32> to vector<8x128xf32>
    %cst_81 = arith.constant 1.000000e+00 : f32
    %243 = vector.broadcast %cst_81 : f32 to vector<8x128xf32>
    %244 = arith.subf %238, %243 : vector<8x128xf32>
    %245 = arith.select %240, %244, %238 : vector<8x128xi1>, vector<8x128xf32>
    %246 = arith.addf %233, %242 : vector<8x128xf32>
    %cst_82 = arith.constant dense<0.000000e+00> : vector<8x128xf32>
    %247 = tpu.matmul %242, %1, %cst_82 {dimension_numbers = #tpu.dot_dimension_numbers<[1], [0], [0], [1], [0, 0, 1, 1], [], []>} : vector<8x128xf32>, vector<128x128xf32>, vector<8x128xf32> -> vector<8x128xf32>
    %248 = arith.addf %8, %247 : vector<8x128xf32>
    %cst_83 = arith.constant 0.899999976 : f32
    %249 = vector.broadcast %cst_83 : f32 to vector<8x128xf32>
    %250 = arith.mulf %249, %245 : vector<8x128xf32>
    %251 = arith.addf %250, %248 : vector<8x128xf32>
    %cst_84 = arith.constant 1.000000e+00 : f32
    %252 = vector.broadcast %cst_84 : f32 to vector<8x128xf32>
    %253 = arith.cmpf ogt, %251, %252 : vector<8x128xf32>
    %254 = arith.extui %253 : vector<8x128xi1> to vector<8x128xi32>
    %255 = arith.sitofp %254 : vector<8x128xi32> to vector<8x128xf32>
    %256 = arith.addf %246, %255 : vector<8x128xf32>
    %cst_85 = arith.constant dense<0.000000e+00> : vector<8x32xf32>
    %257 = tpu.matmul %256, %3, %cst_85 {dimension_numbers = #tpu.dot_dimension_numbers<[1], [0], [0], [1], [0, 0, 1, 1], [], []>} : vector<8x128xf32>, vector<128x32xf32>, vector<8x32xf32> -> vector<8x32xf32>
    %cst_86 = arith.constant 1.900000e+01 : f32
    %258 = vector.broadcast %cst_86 : f32 to vector<1x32xf32>
    %259 = arith.mulf %258, %4 : vector<1x32xf32>
    %260 = vector.broadcast %259 : vector<1x32xf32> to vector<8x32xf32>
    %261 = arith.addf %257, %260 : vector<8x32xf32>
    %c0_87 = arith.constant 0 : index
    %c0_88 = arith.constant 0 : index
    %262 = vector.load %arg4[%c0_87, %c0_88] : memref<8x32xf32, #tpu.memory_space<vmem>>, vector<8x32xf32>
    tpu.vector_store %arg4[%c0_87, %c0_88], %261 {strides = array<i32>} : memref<8x32xf32, #tpu.memory_space<vmem>>, vector<8x32xf32>,
    return
  }
  func.func @transform_0(%arg0: i32) -> (i32, i32) {
    %c0_i32 = arith.constant 0 : i32
    %c0_i32_0 = arith.constant 0 : i32
    return %arg0, %c0_i32 : i32, i32
  }
  func.func @transform_1(%arg0: i32) -> (i32, i32) {
    %c0_i32 = arith.constant 0 : i32
    %c0_i32_0 = arith.constant 0 : i32
    %c0_i32_1 = arith.constant 0 : i32
    return %c0_i32, %c0_i32_0 : i32, i32
  }
  func.func @transform_2(%arg0: i32) -> (i32, i32) {
    %c0_i32 = arith.constant 0 : i32
    %c0_i32_0 = arith.constant 0 : i32
    %c0_i32_1 = arith.constant 0 : i32
    return %c0_i32, %c0_i32_0 : i32, i32
  }
  func.func @transform_3(%arg0: i32) -> (i32, i32) {
    %c0_i32 = arith.constant 0 : i32
    %c0_i32_0 = arith.constant 0 : i32
    return %arg0, %c0_i32 : i32, i32
  }
}

</mosaic_0001>

<bundles_post_ra>
// kernel: tpu_custom_call.1
= control target key start
LH: loop header
LB: loop body
LE: loop exit
PB: predicated region body
PF: predicated region fallthrough
CT: control target
= control target key end

     0   :  { %vm53_vm0 = vcmask 130048   ;;  %s1291_s0 = inlined_call_operand.vmem [shape: f32[8,16], index: 0, kind: input, shape index: {}]   ;;  %s1292_s1 = inlined_call_operand.vmem [shape: f32[152,128], index: 1, kind: input, shape index: {}]   ;;  %s1293_s2 = inlined_call_operand.vmem [shape: f32[136,32], index: 2, kind: input, shape index: {}]   ;;  %s1294_s3 = inlined_call_operand.hbm [shape: f32[8,32], index: 3, kind: output, shape index: {}]  }
   0x1   :  { %v16_v0 = vld [vmem:[%s1292_s1 + $0x8] sm:$0xff]  ;;  %v15_v1 = vld [vmem:[%s1292_s1] sm:$0xff]  ;;  %v802_v5 = vld [vmem:[%s1292_s1 + $0x78] sm:$0xff] }
   0x2   :  { %71 = vmatpush.msra.mxu0 %v16_v0  ;;  %v51_v2 = vld [vmem:[%s1291_s0] sm:$0xff]  ;;  %v790_v3 = vld [vmem:[%s1292_s1 + $0x88] sm:$0xff]  ;;  %v809_v6 = vld [vmem:[%s1292_s1 + $0x70] sm:$0xff] }
   0x3   :  { %v795_v4 = vld [vmem:[%s1292_s1 + $0x80] sm:$0xff]  ;;  %80 = vmatpush.msra.mxu1 %v790_v3  ;;  %107 = vmatpush.msra.mxu2 %v790_v3 }
   0x4   :  { %72 = vmatpush.msra.mxu0 %v15_v1  ;;  %136 = vmatpush.msra.mxu3 %v790_v3 }
   0x5   :  { %667 = vmatmul.msk.f32.vlgmr.msra.gmra.mxu0 %vm53_vm0, %v51_v2  ;;  %81 = vmatpush.msra.mxu1 %v795_v4 }
   0x6   :  { %108 = vmatpush.msra.mxu2 %v795_v4  ;;  %137 = vmatpush.msra.mxu3 %v795_v4 }
   0x7   :  { %82 = vmatpush.msra.mxu1 %v802_v5  ;;  %165 = vmatpush.msrb.mxu0 %v790_v3 }
   0x8   :  { %8 = vsyncpa [#allocation3], 0  ;;  %v818_v7 = vld [vmem:[%s1292_s1 + $0x68] sm:$0xff]  ;;  %109 = vmatpush.msra.mxu2 %v802_v5  ;;  %138 = vmatpush.msra.mxu3 %v802_v5  ;;  %v827_v8 = vld [vmem:[%s1292_s1 + $0x60] sm:$0xff]  ;;  %v755_v22 = vmov 1.0   ;;  %v756_v32 = vmov 0.0  }
   0x9   :  { %83 = vmatpush.msra.mxu1 %v809_v6  ;;  %166 = vmatpush.msrb.mxu0 %v795_v4  ;;  %v836_v9 = vld [vmem:[%s1292_s1 + $0x58] sm:$0xff]  ;;  %v845_v10 = vld [vmem:[%s1292_s1 + $0x50] sm:$0xff]  ;;  %v854_v11 = vld [vmem:[%s1292_s1 + $0x48] sm:$0xff]  ;;  %s757_s27 = smov [#allocation2]   ;;  %s658_s4 = sshll.u32 %s1294_s3, 4  ;;  %s659_s4 = int_to_ptr.hbm [resolvable:$true] %s658_s4 }
   0xa   :  { %110 = vmatpush.msra.mxu2 %v809_v6  ;;  %139 = vmatpush.msra.mxu3 %v809_v6  ;;  %v863_v12 = vld [vmem:[%s1292_s1 + $0x40] sm:$0xff]  ;;  %v872_v13 = vld [vmem:[%s1292_s1 + $0x38] sm:$0xff]  ;;  %v881_v14 = vld [vmem:[%s1292_s1 + $0x30] sm:$0xff]  ;;  %s656_s28 = sshll.u32 %s757_s27, 4  ;;  %s657_s28 = int_to_ptr.vmem [resolvable:$true] %s656_s28 }
   0xb   :  { %84 = vmatpush.msra.mxu1 %v818_v7  ;;  %167 = vmatpush.msrb.mxu0 %v802_v5  ;;  %v890_v15 = vld [vmem:[%s1292_s1 + $0x28] sm:$0xff]  ;;  %v899_v16 = vld [vmem:[%s1292_s1 + $0x20] sm:$0xff]  ;;  %v916_v17 = vld [vmem:[%s1292_s1 + $0x18] sm:$0xff] }
   0xc   :  { %111 = vmatpush.msra.mxu2 %v818_v7  ;;  %140 = vmatpush.msra.mxu3 %v818_v7  ;;  %v922_v18 = vld [vmem:[%s1292_s1 + $0x10] sm:$0xff] }
   0xd   :  { %85 = vmatpush.msra.mxu1 %v827_v8  ;;  %168 = vmatpush.msrb.mxu0 %v809_v6  ;;  %v728_v19 = vld [vmem:[%s1292_s1 + $0x90] ss:$0 sm:$0xff] }
   0xe   :  { %112 = vmatpush.msra.mxu2 %v827_v8  ;;  %141 = vmatpush.msra.mxu3 %v827_v8 }
   0xf   :  { %86 = vmatpush.msra.mxu1 %v836_v9  ;;  %169 = vmatpush.msrb.mxu0 %v818_v7 }
  0x10   :  { %113 = vmatpush.msra.mxu2 %v836_v9  ;;  %142 = vmatpush.msra.mxu3 %v836_v9 }
  0x11   :  { %87 = vmatpush.msra.mxu1 %v845_v10  ;;  %170 = vmatpush.msrb.mxu0 %v827_v8 }
  0x12   :  { %114 = vmatpush.msra.mxu2 %v845_v10  ;;  %143 = vmatpush.msra.mxu3 %v845_v10 }
  0x13   :  { %88 = vmatpush.msra.mxu1 %v854_v11  ;;  %171 = vmatpush.msrb.mxu0 %v836_v9 }
  0x14   :  { %115 = vmatpush.msra.mxu2 %v854_v11  ;;  %144 = vmatpush.msra.mxu3 %v854_v11 }
  0x15   :  { %89 = vmatpush.msra.mxu1 %v863_v12  ;;  %172 = vmatpush.msrb.mxu0 %v845_v10 }
  0x16   :  { %116 = vmatpush.msra.mxu2 %v863_v12  ;;  %145 = vmatpush.msra.mxu3 %v863_v12 }
  0x17   :  { %90 = vmatpush.msra.mxu1 %v872_v13  ;;  %173 = vmatpush.msrb.mxu0 %v854_v11 }
  0x18   :  { %117 = vmatpush.msra.mxu2 %v872_v13  ;;  %146 = vmatpush.msra.mxu3 %v872_v13 }
  0x19   :  { %91 = vmatpush.msra.mxu1 %v881_v14  ;;  %174 = vmatpush.msrb.mxu0 %v863_v12 }
  0x1a   :  { %118 = vmatpush.msra.mxu2 %v881_v14  ;;  %147 = vmatpush.msra.mxu3 %v881_v14 }
  0x1b   :  { %92 = vmatpush.msra.mxu1 %v890_v15  ;;  %175 = vmatpush.msrb.mxu0 %v872_v13 }
  0x1c   :  { %119 = vmatpush.msra.mxu2 %v890_v15  ;;  %148 = vmatpush.msra.mxu3 %v890_v15 }
  0x1d   :  { %93 = vmatpush.msra.mxu1 %v899_v16  ;;  %176 = vmatpush.msrb.mxu0 %v881_v14 }
  0x1e   :  { %120 = vmatpush.msra.mxu2 %v899_v16  ;;  %149 = vmatpush.msra.mxu3 %v899_v16 }
  0x1f   :  { %177 = vmatpush.msrb.mxu0 %v890_v15  ;;  %94 = vmatpush.msra.mxu1 %v916_v17 }
  0x20   :  { %121 = vmatpush.msra.mxu2 %v916_v17  ;;  %150 = vmatpush.msra.mxu3 %v916_v17 }
  0x21   :  { %178 = vmatpush.msrb.mxu0 %v899_v16  ;;  %95 = vmatpush.msra.mxu1 %v922_v18 }
  0x22   :  { %122 = vmatpush.msra.mxu2 %v922_v18  ;;  %151 = vmatpush.msra.mxu3 %v922_v18 }
  0x23   :  { %179 = vmatpush.msrb.mxu0 %v916_v17  ;;  %194 = vmatpush.msrb.mxu1 %v790_v3 }
  0x24   :  { %223 = vmatpush.msrb.mxu2 %v790_v3  ;;  %252 = vmatpush.msrb.mxu3 %v790_v3 }
  0x25   :  { %180 = vmatpush.msrb.mxu0 %v922_v18  ;;  %195 = vmatpush.msrb.mxu1 %v795_v4 }
  0x26   :  { %224 = vmatpush.msrb.mxu2 %v795_v4  ;;  %253 = vmatpush.msrb.mxu3 %v795_v4 }
  0x27   :  { %281 = vmatpush.msra.mxu0 %v790_v3  ;;  %196 = vmatpush.msrb.mxu1 %v802_v5 }
  0x28   :  { %225 = vmatpush.msrb.mxu2 %v802_v5  ;;  %254 = vmatpush.msrb.mxu3 %v802_v5 }
  0x29   :  { %282 = vmatpush.msra.mxu0 %v795_v4  ;;  %197 = vmatpush.msrb.mxu1 %v809_v6 }
  0x2a   :  { %226 = vmatpush.msrb.mxu2 %v809_v6  ;;  %255 = vmatpush.msrb.mxu3 %v809_v6 }
  0x2b   :  { %283 = vmatpush.msra.mxu0 %v802_v5  ;;  %198 = vmatpush.msrb.mxu1 %v818_v7 }
  0x2c   :  { %227 = vmatpush.msrb.mxu2 %v818_v7  ;;  %256 = vmatpush.msrb.mxu3 %v818_v7 }
  0x2d   :  { %284 = vmatpush.msra.mxu0 %v809_v6  ;;  %199 = vmatpush.msrb.mxu1 %v827_v8 }
  0x2e   :  { %228 = vmatpush.msrb.mxu2 %v827_v8  ;;  %257 = vmatpush.msrb.mxu3 %v827_v8 }
  0x2f   :  { %285 = vmatpush.msra.mxu0 %v818_v7  ;;  %200 = vmatpush.msrb.mxu1 %v836_v9 }
  0x30   :  { %229 = vmatpush.msrb.mxu2 %v836_v9  ;;  %258 = vmatpush.msrb.mxu3 %v836_v9 }
  0x31   :  { %286 = vmatpush.msra.mxu0 %v827_v8  ;;  %201 = vmatpush.msrb.mxu1 %v845_v10 }
  0x32   :  { %230 = vmatpush.msrb.mxu2 %v845_v10  ;;  %259 = vmatpush.msrb.mxu3 %v845_v10 }
  0x33   :  { %287 = vmatpush.msra.mxu0 %v836_v9  ;;  %202 = vmatpush.msrb.mxu1 %v854_v11 }
  0x34   :  { %231 = vmatpush.msrb.mxu2 %v854_v11  ;;  %260 = vmatpush.msrb.mxu3 %v854_v11 }
  0x35   :  { %288 = vmatpush.msra.mxu0 %v845_v10  ;;  %203 = vmatpush.msrb.mxu1 %v863_v12 }
  0x36   :  { %232 = vmatpush.msrb.mxu2 %v863_v12  ;;  %261 = vmatpush.msrb.mxu3 %v863_v12 }
  0x37   :  { %289 = vmatpush.msra.mxu0 %v854_v11  ;;  %204 = vmatpush.msrb.mxu1 %v872_v13 }
  0x38   :  { %233 = vmatpush.msrb.mxu2 %v872_v13  ;;  %262 = vmatpush.msrb.mxu3 %v872_v13 }
  0x39   :  { %290 = vmatpush.msra.mxu0 %v863_v12  ;;  %205 = vmatpush.msrb.mxu1 %v881_v14 }
  0x3a   :  { %234 = vmatpush.msrb.mxu2 %v881_v14  ;;  %263 = vmatpush.msrb.mxu3 %v881_v14 }
  0x3b   :  { %291 = vmatpush.msra.mxu0 %v872_v13  ;;  %206 = vmatpush.msrb.mxu1 %v890_v15 }
  0x3c   :  { %235 = vmatpush.msrb.mxu2 %v890_v15  ;;  %264 = vmatpush.msrb.mxu3 %v890_v15 }
  0x3d   :  { %292 = vmatpush.msra.mxu0 %v881_v14  ;;  %207 = vmatpush.msrb.mxu1 %v899_v16 }
  0x3e   :  { %236 = vmatpush.msrb.mxu2 %v899_v16  ;;  %265 = vmatpush.msrb.mxu3 %v899_v16 }
  0x3f   :  { %293 = vmatpush.msra.mxu0 %v890_v15  ;;  %208 = vmatpush.msrb.mxu1 %v916_v17 }
  0x40   :  { %237 = vmatpush.msrb.mxu2 %v916_v17  ;;  %266 = vmatpush.msrb.mxu3 %v916_v17 }
  0x41   :  { %294 = vmatpush.msra.mxu0 %v899_v16  ;;  %209 = vmatpush.msrb.mxu1 %v922_v18 }
  0x42   :  { %238 = vmatpush.msrb.mxu2 %v922_v18  ;;  %267 = vmatpush.msrb.mxu3 %v922_v18 }
  0x43   :  { %295 = vmatpush.msra.mxu0 %v916_v17 }
  0x45   :  { %296 = vmatpush.msra.mxu0 %v922_v18 }
  0x82   :  { %v74_v20 = vpop.f32.mrf.mxu0 }
  0x83   :  { %v990_v21 = vadd.f32 %v728_v19, %v74_v20 }
  0x85   :  { %vm77_vm1 = vcmp.gt.f32.partialorder %v990_v21, 1.0 }
  0x86   :  { %669 = vmatmul.msk.f32.vlgmr.msra.gmra.mxu1 %vm77_vm1, %v755_v22 }
  0x87   :  { %310 = vmatpush.msra.mxu1 %v790_v3 }
  0x89   :  { %311 = vmatpush.msra.mxu1 %v795_v4 }
  0x8b   :  { %312 = vmatpush.msra.mxu1 %v802_v5 }
  0x8d   :  { %313 = vmatpush.msra.mxu1 %v809_v6 }
  0x8f   :  { %314 = vmatpush.msra.mxu1 %v818_v7 }
  0x91   :  { %315 = vmatpush.msra.mxu1 %v827_v8 }
  0x93   :  { %316 = vmatpush.msra.mxu1 %v836_v9 }
  0x95   :  { %317 = vmatpush.msra.mxu1 %v845_v10 }
  0x97   :  { %318 = vmatpush.msra.mxu1 %v854_v11 }
  0x99   :  { %319 = vmatpush.msra.mxu1 %v863_v12 }
  0x9b   :  { %320 = vmatpush.msra.mxu1 %v872_v13 }
  0x9d   :  { %321 = vmatpush.msra.mxu1 %v881_v14 }
  0x9f   :  { %322 = vmatpush.msra.mxu1 %v890_v15 }
  0xa1   :  { %323 = vmatpush.msra.mxu1 %v899_v16 }
  0xa3   :  { %324 = vmatpush.msra.mxu1 %v916_v17 }
  0xa5   :  { %325 = vmatpush.msra.mxu1 %v922_v18 }
 0x103   :  { %v97_v23 = vpop.f32.mrf.mxu1 }
 0x104   :  { %v100_v24 = vadd.f32 %v97_v23, %v990_v21 }
 0x106   :  { %v671_v25 = vadd.f32 -1.0, %v100_v24  ;;  %vm102_vm2 = vcmp.gt.f32.partialorder %v100_v24, 1.0 }
 0x107   :  { %672 = vmatmul.msk.f32.vlgmr.msra.gmra.mxu2 %vm102_vm2, %v755_v22  ;;  %v670_v33 = vsel %vm102_vm2, 1.0, %v756_v32 }
 0x108   :  { %v106_v26 = vsel %vm102_vm2, %v671_v25, %v100_v24  ;;  %339 = vmatpush.msra.mxu2 %v790_v3 }
 0x109   :  { %v128_v28 = vmul.f32 0.9, %v106_v26 }
 0x10a   :  { %340 = vmatpush.msra.mxu2 %v795_v4 }
 0x10c   :  { %341 = vmatpush.msra.mxu2 %v802_v5 }
 0x10e   :  { %342 = vmatpush.msra.mxu2 %v809_v6 }
 0x110   :  { %343 = vmatpush.msra.mxu2 %v818_v7 }
 0x112   :  { %344 = vmatpush.msra.mxu2 %v827_v8 }
 0x114   :  { %345 = vmatpush.msra.mxu2 %v836_v9 }
 0x116   :  { %346 = vmatpush.msra.mxu2 %v845_v10 }
 0x118   :  { %347 = vmatpush.msra.mxu2 %v854_v11 }
 0x11a   :  { %348 = vmatpush.msra.mxu2 %v863_v12 }
 0x11c   :  { %349 = vmatpush.msra.mxu2 %v872_v13 }
 0x11e   :  { %350 = vmatpush.msra.mxu2 %v881_v14 }
 0x120   :  { %351 = vmatpush.msra.mxu2 %v890_v15 }
 0x122   :  { %352 = vmatpush.msra.mxu2 %v899_v16 }
 0x124   :  { %353 = vmatpush.msra.mxu2 %v916_v17 }
 0x126   :  { %354 = vmatpush.msra.mxu2 %v922_v18 }
 0x18a   :  { %v124_v27 = vpop.f32.mrf.mxu2 }
 0x18b   :  { %v127_v29 = vadd.f32 %v124_v27, %v990_v21 }
 0x18d   :  { %v129_v30 = vadd.f32 %v128_v28, %v127_v29 }
 0x18f   :  { %v674_v31 = vadd.f32 -1.0, %v129_v30  ;;  %vm130_vm3 = vcmp.gt.f32.partialorder %v129_v30, 1.0 }
 0x190   :  { %v673_v34 = vsel %vm130_vm3, 1.0, %v756_v32  ;;  %675 = vmatmul.msk.f32.vlgmr.msra.gmra.mxu3 %vm130_vm3, %v755_v22 }
 0x191   :  { %v134_v35 = vsel %vm130_vm3, %v674_v31, %v129_v30  ;;  %v135_v36 = vadd.f32 %v673_v34, %v670_v33  ;;  %368 = vmatpush.msra.mxu3 %v790_v3 }
 0x192   :  { %v157_v38 = vmul.f32 0.9, %v134_v35 }
 0x193   :  { %369 = vmatpush.msra.mxu3 %v795_v4 }
 0x195   :  { %370 = vmatpush.msra.mxu3 %v802_v5 }
 0x197   :  { %371 = vmatpush.msra.mxu3 %v809_v6 }
 0x199   :  { %372 = vmatpush.msra.mxu3 %v818_v7 }
 0x19b   :  { %373 = vmatpush.msra.mxu3 %v827_v8 }
 0x19d   :  { %374 = vmatpush.msra.mxu3 %v836_v9 }
 0x19f   :  { %375 = vmatpush.msra.mxu3 %v845_v10 }
 0x1a1   :  { %376 = vmatpush.msra.mxu3 %v854_v11 }
 0x1a3   :  { %377 = vmatpush.msra.mxu3 %v863_v12 }
 0x1a5   :  { %378 = vmatpush.msra.mxu3 %v872_v13 }
 0x1a7   :  { %379 = vmatpush.msra.mxu3 %v881_v14 }
 0x1a9   :  { %380 = vmatpush.msra.mxu3 %v890_v15 }
 0x1ab   :  { %381 = vmatpush.msra.mxu3 %v899_v16 }
 0x1ad   :  { %382 = vmatpush.msra.mxu3 %v916_v17 }
 0x1af   :  { %383 = vmatpush.msra.mxu3 %v922_v18 }
 0x213   :  { %v153_v37 = vpop.f32.mrf.mxu3 }
 0x214   :  { %v156_v39 = vadd.f32 %v153_v37, %v990_v21 }
 0x216   :  { %v158_v40 = vadd.f32 %v157_v38, %v156_v39 }
 0x218   :  { %v677_v41 = vadd.f32 -1.0, %v158_v40  ;;  %vm159_vm4 = vcmp.gt.f32.partialorder %v158_v40, 1.0 }
 0x219   :  { %v676_v42 = vsel %vm159_vm4, 1.0, %v756_v32  ;;  %678 = vmatmul.msk.f32.vlgmr.msrb.gmra.mxu0 %vm159_vm4, %v755_v22 }
 0x21a   :  { %v164_v43 = vadd.f32 %v676_v42, %v135_v36  ;;  %v163_v44 = vsel %vm159_vm4, %v677_v41, %v158_v40  ;;  %397 = vmatpush.msrb.mxu0 %v790_v3 }
 0x21b   :  { %v186_v47 = vmul.f32 0.9, %v163_v44 }
 0x21c   :  { %398 = vmatpush.msrb.mxu0 %v795_v4 }
 0x21e   :  { %399 = vmatpush.msrb.mxu0 %v802_v5 }
 0x220   :  { %400 = vmatpush.msrb.mxu0 %v809_v6 }
 0x222   :  { %401 = vmatpush.msrb.mxu0 %v818_v7 }
 0x224   :  { %402 = vmatpush.msrb.mxu0 %v827_v8 }
 0x226   :  { %403 = vmatpush.msrb.mxu0 %v836_v9 }
 0x228   :  { %404 = vmatpush.msrb.mxu0 %v845_v10 }
 0x22a   :  { %405 = vmatpush.msrb.mxu0 %v854_v11 }
 0x22c   :  { %406 = vmatpush.msrb.mxu0 %v863_v12 }
 0x22e   :  { %407 = vmatpush.msrb.mxu0 %v872_v13 }
 0x230   :  { %408 = vmatpush.msrb.mxu0 %v881_v14 }
 0x232   :  { %409 = vmatpush.msrb.mxu0 %v890_v15 }
 0x234   :  { %410 = vmatpush.msrb.mxu0 %v899_v16 }
 0x236   :  { %411 = vmatpush.msrb.mxu0 %v916_v17 }
 0x238   :  { %412 = vmatpush.msrb.mxu0 %v922_v18 }
 0x296   :  { %v182_v45 = vpop.f32.mrf.mxu0 }
 0x297   :  { %v185_v46 = vadd.f32 %v182_v45, %v990_v21 }
 0x299   :  { %v187_v48 = vadd.f32 %v186_v47, %v185_v46 }
 0x29b   :  { %v680_v49 = vadd.f32 -1.0, %v187_v48  ;;  %vm188_vm5 = vcmp.gt.f32.partialorder %v187_v48, 1.0 }
 0x29c   :  { %v679_v50 = vsel %vm188_vm5, 1.0, %v756_v32  ;;  %681 = vmatmul.msk.f32.vlgmr.msrb.gmra.mxu1 %vm188_vm5, %v755_v22 }
 0x29d   :  { %v193_v51 = vadd.f32 %v679_v50, %v164_v43  ;;  %v192_v52 = vsel %vm188_vm5, %v680_v49, %v187_v48  ;;  %426 = vmatpush.msrb.mxu1 %v790_v3  ;;  %vm649_vm5 = vcmask 261120  }
 0x29e   :  { %v215_v55 = vmul.f32 0.9, %v192_v52 }
 0x29f   :  { %427 = vmatpush.msrb.mxu1 %v795_v4 }
 0x2a1   :  { %428 = vmatpush.msrb.mxu1 %v802_v5 }
 0x2a3   :  { %429 = vmatpush.msrb.mxu1 %v809_v6 }
 0x2a5   :  { %430 = vmatpush.msrb.mxu1 %v818_v7 }
 0x2a7   :  { %431 = vmatpush.msrb.mxu1 %v827_v8 }
 0x2a9   :  { %432 = vmatpush.msrb.mxu1 %v836_v9 }
 0x2ab   :  { %433 = vmatpush.msrb.mxu1 %v845_v10 }
 0x2ad   :  { %434 = vmatpush.msrb.mxu1 %v854_v11 }
 0x2af   :  { %435 = vmatpush.msrb.mxu1 %v863_v12 }
 0x2b1   :  { %436 = vmatpush.msrb.mxu1 %v872_v13 }
 0x2b3   :  { %437 = vmatpush.msrb.mxu1 %v881_v14 }
 0x2b5   :  { %438 = vmatpush.msrb.mxu1 %v890_v15 }
 0x2b7   :  { %439 = vmatpush.msrb.mxu1 %v899_v16 }
 0x2b9   :  { %440 = vmatpush.msrb.mxu1 %v916_v17 }
 0x2bb   :  { %441 = vmatpush.msrb.mxu1 %v922_v18 }
 0x319   :  { %v211_v53 = vpop.f32.mrf.mxu1 }
 0x31a   :  { %v214_v54 = vadd.f32 %v211_v53, %v990_v21 }
 0x31c   :  { %v216_v56 = vadd.f32 %v215_v55, %v214_v54 }
 0x31e   :  { %v683_v57 = vadd.f32 -1.0, %v216_v56  ;;  %vm217_vm6 = vcmp.gt.f32.partialorder %v216_v56, 1.0 }
 0x31f   :  { %v682_v58 = vsel %vm217_vm6, 1.0, %v756_v32  ;;  %684 = vmatmul.msk.f32.vlgmr.msrb.gmra.mxu2 %vm217_vm6, %v755_v22 }
 0x320   :  { %v222_v59 = vadd.f32 %v682_v58, %v193_v51  ;;  %v221_v60 = vsel %vm217_vm6, %v683_v57, %v216_v56  ;;  %455 = vmatpush.msrb.mxu2 %v790_v3 }
 0x321   :  { %v244_v63 = vmul.f32 0.9, %v221_v60 }
 0x322   :  { %456 = vmatpush.msrb.mxu2 %v795_v4 }
 0x324   :  { %457 = vmatpush.msrb.mxu2 %v802_v5 }
 0x326   :  { %458 = vmatpush.msrb.mxu2 %v809_v6 }
 0x328   :  { %459 = vmatpush.msrb.mxu2 %v818_v7 }
 0x32a   :  { %460 = vmatpush.msrb.mxu2 %v827_v8 }
 0x32c   :  { %461 = vmatpush.msrb.mxu2 %v836_v9 }
 0x32e   :  { %462 = vmatpush.msrb.mxu2 %v845_v10 }
 0x330   :  { %463 = vmatpush.msrb.mxu2 %v854_v11 }
 0x332   :  { %464 = vmatpush.msrb.mxu2 %v863_v12 }
 0x334   :  { %465 = vmatpush.msrb.mxu2 %v872_v13 }
 0x336   :  { %466 = vmatpush.msrb.mxu2 %v881_v14 }
 0x338   :  { %467 = vmatpush.msrb.mxu2 %v890_v15 }
 0x33a   :  { %468 = vmatpush.msrb.mxu2 %v899_v16 }
 0x33c   :  { %469 = vmatpush.msrb.mxu2 %v916_v17 }
 0x33e   :  { %470 = vmatpush.msrb.mxu2 %v922_v18 }
 0x3a2   :  { %v240_v61 = vpop.f32.mrf.mxu2 }
 0x3a3   :  { %v243_v62 = vadd.f32 %v240_v61, %v990_v21 }
 0x3a5   :  { %v245_v0 = vadd.f32 %v244_v63, %v243_v62 }
 0x3a7   :  { %v686_v1 = vadd.f32 -1.0, %v245_v0  ;;  %vm246_vm7 = vcmp.gt.f32.partialorder %v245_v0, 1.0 }
 0x3a8   :  { %v685_v2 = vsel %vm246_vm7, 1.0, %v756_v32  ;;  %687 = vmatmul.msk.f32.vlgmr.msrb.gmra.mxu3 %vm246_vm7, %v755_v22 }
 0x3a9   :  { %v251_v19 = vadd.f32 %v685_v2, %v222_v59  ;;  %v250_v20 = vsel %vm246_vm7, %v686_v1, %v245_v0  ;;  %484 = vmatpush.msrb.mxu3 %v790_v3 }
 0x3aa   :  { %v273_v25 = vmul.f32 0.9, %v250_v20 }
 0x3ab   :  { %485 = vmatpush.msrb.mxu3 %v795_v4 }
 0x3ad   :  { %486 = vmatpush.msrb.mxu3 %v802_v5 }
 0x3af   :  { %487 = vmatpush.msrb.mxu3 %v809_v6 }
 0x3b1   :  { %488 = vmatpush.msrb.mxu3 %v818_v7 }
 0x3b3   :  { %489 = vmatpush.msrb.mxu3 %v827_v8 }
 0x3b5   :  { %490 = vmatpush.msrb.mxu3 %v836_v9 }
 0x3b7   :  { %491 = vmatpush.msrb.mxu3 %v845_v10 }
 0x3b9   :  { %492 = vmatpush.msrb.mxu3 %v854_v11 }
 0x3bb   :  { %493 = vmatpush.msrb.mxu3 %v863_v12 }
 0x3bd   :  { %494 = vmatpush.msrb.mxu3 %v872_v13 }
 0x3bf   :  { %495 = vmatpush.msrb.mxu3 %v881_v14 }
 0x3c1   :  { %496 = vmatpush.msrb.mxu3 %v890_v15 }
 0x3c3   :  { %497 = vmatpush.msrb.mxu3 %v899_v16 }
 0x3c5   :  { %498 = vmatpush.msrb.mxu3 %v916_v17 }
 0x3c7   :  { %499 = vmatpush.msrb.mxu3 %v922_v18 }
 0x42b   :  { %v269_v23 = vpop.f32.mrf.mxu3 }
 0x42c   :  { %v272_v24 = vadd.f32 %v269_v23, %v990_v21 }
 0x42e   :  { %v274_v26 = vadd.f32 %v273_v25, %v272_v24 }
 0x430   :  { %v689_v27 = vadd.f32 -1.0, %v274_v26  ;;  %vm275_vm8 = vcmp.gt.f32.partialorder %v274_v26, 1.0 }
 0x431   :  { %v688_v28 = vsel %vm275_vm8, 1.0, %v756_v32  ;;  %690 = vmatmul.msk.f32.vlgmr.msra.gmra.mxu0 %vm275_vm8, %v755_v22 }
 0x432   :  { %v280_v29 = vadd.f32 %v688_v28, %v251_v19  ;;  %v279_v30 = vsel %vm275_vm8, %v689_v27, %v274_v26  ;;  %513 = vmatpush.msra.mxu0 %v790_v3 }
 0x433   :  { %v302_v34 = vmul.f32 0.9, %v279_v30 }
 0x434   :  { %514 = vmatpush.msra.mxu0 %v795_v4 }
 0x436   :  { %515 = vmatpush.msra.mxu0 %v802_v5 }
 0x438   :  { %516 = vmatpush.msra.mxu0 %v809_v6 }
 0x43a   :  { %517 = vmatpush.msra.mxu0 %v818_v7 }
 0x43c   :  { %518 = vmatpush.msra.mxu0 %v827_v8 }
 0x43e   :  { %519 = vmatpush.msra.mxu0 %v836_v9 }
 0x440   :  { %520 = vmatpush.msra.mxu0 %v845_v10 }
 0x442   :  { %521 = vmatpush.msra.mxu0 %v854_v11 }
 0x444   :  { %522 = vmatpush.msra.mxu0 %v863_v12 }
 0x446   :  { %523 = vmatpush.msra.mxu0 %v872_v13 }
 0x448   :  { %524 = vmatpush.msra.mxu0 %v881_v14 }
 0x44a   :  { %525 = vmatpush.msra.mxu0 %v890_v15 }
 0x44c   :  { %526 = vmatpush.msra.mxu0 %v899_v16 }
 0x44e   :  { %527 = vmatpush.msra.mxu0 %v916_v17 }
 0x450   :  { %528 = vmatpush.msra.mxu0 %v922_v18 }
 0x4ae   :  { %v298_v31 = vpop.f32.mrf.mxu0 }
 0x4af   :  { %v301_v33 = vadd.f32 %v298_v31, %v990_v21 }
 0x4b1   :  { %v303_v35 = vadd.f32 %v302_v34, %v301_v33 }
 0x4b3   :  { %v692_v36 = vadd.f32 -1.0, %v303_v35  ;;  %vm304_vm9 = vcmp.gt.f32.partialorder %v303_v35, 1.0 }
 0x4b4   :  { %v691_v37 = vsel %vm304_vm9, 1.0, %v756_v32  ;;  %693 = vmatmul.msk.f32.vlgmr.msra.gmra.mxu1 %vm304_vm9, %v755_v22 }
 0x4b5   :  { %v309_v38 = vadd.f32 %v691_v37, %v280_v29  ;;  %v308_v39 = vsel %vm304_vm9, %v692_v36, %v303_v35  ;;  %542 = vmatpush.msra.mxu1 %v790_v3 }
 0x4b6   :  { %v331_v42 = vmul.f32 0.9, %v308_v39 }
 0x4b7   :  { %543 = vmatpush.msra.mxu1 %v795_v4 }
 0x4b9   :  { %544 = vmatpush.msra.mxu1 %v802_v5 }
 0x4bb   :  { %545 = vmatpush.msra.mxu1 %v809_v6 }
 0x4bd   :  { %546 = vmatpush.msra.mxu1 %v818_v7 }
 0x4bf   :  { %547 = vmatpush.msra.mxu1 %v827_v8 }
 0x4c1   :  { %548 = vmatpush.msra.mxu1 %v836_v9 }
 0x4c3   :  { %549 = vmatpush.msra.mxu1 %v845_v10 }
 0x4c5   :  { %550 = vmatpush.msra.mxu1 %v854_v11 }
 0x4c7   :  { %551 = vmatpush.msra.mxu1 %v863_v12 }
 0x4c9   :  { %552 = vmatpush.msra.mxu1 %v872_v13 }
 0x4cb   :  { %553 = vmatpush.msra.mxu1 %v881_v14 }
 0x4cd   :  { %554 = vmatpush.msra.mxu1 %v890_v15 }
 0x4cf   :  { %555 = vmatpush.msra.mxu1 %v899_v16 }
 0x4d1   :  { %556 = vmatpush.msra.mxu1 %v916_v17 }
 0x4d3   :  { %557 = vmatpush.msra.mxu1 %v922_v18 }
 0x531   :  { %v327_v40 = vpop.f32.mrf.mxu1 }
 0x532   :  { %v330_v41 = vadd.f32 %v327_v40, %v990_v21 }
 0x534   :  { %v332_v43 = vadd.f32 %v331_v42, %v330_v41 }
 0x536   :  { %v695_v44 = vadd.f32 -1.0, %v332_v43  ;;  %vm333_vm10 = vcmp.gt.f32.partialorder %v332_v43, 1.0 }
 0x537   :  { %v694_v45 = vsel %vm333_vm10, 1.0, %v756_v32  ;;  %696 = vmatmul.msk.f32.vlgmr.msra.gmra.mxu2 %vm333_vm10, %v755_v22 }
 0x538   :  { %v338_v46 = vadd.f32 %v694_v45, %v309_v38  ;;  %v337_v47 = vsel %vm333_vm10, %v695_v44, %v332_v43  ;;  %571 = vmatpush.msra.mxu2 %v790_v3 }
 0x539   :  { %v360_v50 = vmul.f32 0.9, %v337_v47 }
 0x53a   :  { %572 = vmatpush.msra.mxu2 %v795_v4 }
 0x53c   :  { %573 = vmatpush.msra.mxu2 %v802_v5 }
 0x53e   :  { %574 = vmatpush.msra.mxu2 %v809_v6 }
 0x540   :  { %575 = vmatpush.msra.mxu2 %v818_v7 }
 0x542   :  { %576 = vmatpush.msra.mxu2 %v827_v8 }
 0x544   :  { %577 = vmatpush.msra.mxu2 %v836_v9 }
 0x546   :  { %578 = vmatpush.msra.mxu2 %v845_v10 }
 0x548   :  { %579 = vmatpush.msra.mxu2 %v854_v11 }
 0x54a   :  { %580 = vmatpush.msra.mxu2 %v863_v12 }
 0x54c   :  { %581 = vmatpush.msra.mxu2 %v872_v13 }
 0x54e   :  { %582 = vmatpush.msra.mxu2 %v881_v14 }
 0x550   :  { %583 = vmatpush.msra.mxu2 %v890_v15 }
 0x552   :  { %584 = vmatpush.msra.mxu2 %v899_v16 }
 0x554   :  { %585 = vmatpush.msra.mxu2 %v916_v17 }
 0x556   :  { %586 = vmatpush.msra.mxu2 %v922_v18 }
 0x5ba   :  { %v356_v48 = vpop.f32.mrf.mxu2 }
 0x5bb   :  { %v359_v49 = vadd.f32 %v356_v48, %v990_v21 }
 0x5bd   :  { %v361_v51 = vadd.f32 %v360_v50, %v359_v49 }
 0x5bf   :  { %v698_v52 = vadd.f32 -1.0, %v361_v51  ;;  %vm362_vm11 = vcmp.gt.f32.partialorder %v361_v51, 1.0 }
 0x5c0   :  { %v697_v53 = vsel %vm362_vm11, 1.0, %v756_v32  ;;  %699 = vmatmul.msk.f32.vlgmr.msra.gmra.mxu3 %vm362_vm11, %v755_v22 }
 0x5c1   :  { %v367_v54 = vadd.f32 %v697_v53, %v338_v46  ;;  %v366_v55 = vsel %vm362_vm11, %v698_v52, %v361_v51  ;;  %600 = vmatpush.msra.mxu3 %v790_v3  ;;  %v49_v51 = vld [vmem:[%s1293_s2 + $0x78] sm:$0xff]  ;;  %v48_v52 = vld [vmem:[%s1293_s2 + $0x70] sm:$0xff]  ;;  %v47_v53 = vld [vmem:[%s1293_s2 + $0x68] sm:$0xff] }
 0x5c3   :  { %601 = vmatpush.msra.mxu3 %v795_v4 }
 0x5c5   :  { %602 = vmatpush.msra.mxu3 %v802_v5  ;;  %v389_v5 = vmul.f32 0.9, %v366_v55  ;;  %v45_v55 = vld [vmem:[%s1293_s2 + $0x58] sm:$0xff] }
 0x5c7   :  { %603 = vmatpush.msra.mxu3 %v809_v6 }
 0x5c9   :  { %604 = vmatpush.msra.mxu3 %v818_v7 }
 0x5cb   :  { %605 = vmatpush.msra.mxu3 %v827_v8 }
 0x5cd   :  { %606 = vmatpush.msra.mxu3 %v836_v9 }
 0x5cf   :  { %607 = vmatpush.msra.mxu3 %v845_v10 }
 0x5d1   :  { %608 = vmatpush.msra.mxu3 %v854_v11 }
 0x5d3   :  { %609 = vmatpush.msra.mxu3 %v863_v12 }
 0x5d5   :  { %610 = vmatpush.msra.mxu3 %v872_v13 }
 0x5d7   :  { %611 = vmatpush.msra.mxu3 %v881_v14 }
 0x5d9   :  { %612 = vmatpush.msra.mxu3 %v890_v15 }
 0x5db   :  { %613 = vmatpush.msra.mxu3 %v899_v16 }
 0x5dd   :  { %614 = vmatpush.msra.mxu3 %v916_v17 }
 0x5df   :  { %615 = vmatpush.msra.mxu3 %v922_v18 }
 0x643   :  { %v385_v3 = vpop.f32.mrf.mxu3 }
 0x644   :  { %v388_v4 = vadd.f32 %v385_v3, %v990_v21  ;;  %v44_v3 = vld [vmem:[%s1293_s2 + $0x50] sm:$0xff] }
 0x646   :  { %v390_v6 = vadd.f32 %v389_v5, %v388_v4  ;;  %v43_v4 = vld [vmem:[%s1293_s2 + $0x48] sm:$0xff]  ;;  %v42_v5 = vld [vmem:[%s1293_s2 + $0x40] sm:$0xff] }
 0x648   :  { %v701_v7 = vadd.f32 -1.0, %v390_v6  ;;  %vm391_vm12 = vcmp.gt.f32.partialorder %v390_v6, 1.0 }
 0x649   :  { %v700_v8 = vsel %vm391_vm12, 1.0, %v756_v32  ;;  %702 = vmatmul.msk.f32.vlgmr.msrb.gmra.mxu0 %vm391_vm12, %v755_v22 }
 0x64a   :  { %v396_v9 = vadd.f32 %v700_v8, %v367_v54  ;;  %v395_v10 = vsel %vm391_vm12, %v701_v7, %v390_v6  ;;  %629 = vmatpush.msrb.mxu0 %v49_v51  ;;  %v46_v54 = vld [vmem:[%s1293_s2 + $0x60] sm:$0xff]  ;;  %v41_v6 = vld [vmem:[%s1293_s2 + $0x38] sm:$0xff]  ;;  %v40_v7 = vld [vmem:[%s1293_s2 + $0x30] sm:$0xff] }
 0x64b   :  { %v418_v13 = vmul.f32 0.9, %v395_v10  ;;  %v39_v8 = vld [vmem:[%s1293_s2 + $0x28] sm:$0xff] }
 0x64c   :  { %630 = vmatpush.msrb.mxu0 %v48_v52 }
 0x64e   :  { %631 = vmatpush.msrb.mxu0 %v47_v53 }
 0x650   :  { %632 = vmatpush.msrb.mxu0 %v46_v54 }
 0x652   :  { %633 = vmatpush.msrb.mxu0 %v45_v55 }
 0x654   :  { %634 = vmatpush.msrb.mxu0 %v44_v3 }
 0x656   :  { %635 = vmatpush.msrb.mxu0 %v43_v4 }
 0x658   :  { %636 = vmatpush.msrb.mxu0 %v42_v5 }
 0x65a   :  { %637 = vmatpush.msrb.mxu0 %v41_v6 }
 0x65c   :  { %638 = vmatpush.msrb.mxu0 %v40_v7 }
 0x65e   :  { %639 = vmatpush.msrb.mxu0 %v39_v8 }
 0x6c6   :  { %v414_v11 = vpop.f32.mrf.mxu0 }
 0x6c7   :  { %v417_v12 = vadd.f32 %v414_v11, %v990_v21 }
 0x6c9   :  { %v419_v14 = vadd.f32 %v418_v13, %v417_v12 }
 0x6cb   :  { %v704_v15 = vadd.f32 -1.0, %v419_v14  ;;  %vm420_vm13 = vcmp.gt.f32.partialorder %v419_v14, 1.0 }
 0x6cc   :  { %v703_v16 = vsel %vm420_vm13, 1.0, %v756_v32  ;;  %705 = vmatmul.msk.f32.vlgmr.msrb.gmra.mxu1 %vm420_vm13, %v755_v22 }
 0x6cd   :  { %v425_v17 = vadd.f32 %v703_v16, %v396_v9  ;;  %v424_v18 = vsel %vm420_vm13, %v704_v15, %v419_v14 }
 0x6ce   :  { %v447_v58 = vmul.f32 0.9, %v424_v18  ;;  %v37_v18 = vld [vmem:[%s1293_s2 + $0x18] sm:$0xff] }
 0x749   :  { %v443_v56 = vpop.f32.mrf.mxu1 }
 0x74a   :  { %v446_v57 = vadd.f32 %v443_v56, %v990_v21  ;;  %v36_v56 = vld [vmem:[%s1293_s2 + $0x10] sm:$0xff] }
 0x74c   :  { %v448_v59 = vadd.f32 %v447_v58, %v446_v57  ;;  %v34_v57 = vld [vmem:[%s1293_s2] sm:$0xff] }
 0x74e   :  { %v707_v60 = vadd.f32 -1.0, %v448_v59  ;;  %vm449_vm14 = vcmp.gt.f32.partialorder %v448_v59, 1.0 }
 0x74f   :  { %v706_v61 = vsel %vm449_vm14, 1.0, %v756_v32  ;;  %708 = vmatmul.msk.f32.vlgmr.msrb.gmra.mxu2 %vm449_vm14, %v755_v22 }
 0x750   :  { %v454_v62 = vadd.f32 %v706_v61, %v425_v17  ;;  %v453_v63 = vsel %vm449_vm14, %v707_v60, %v448_v59  ;;  %v38_v17 = vld [vmem:[%s1293_s2 + $0x20] sm:$0xff] }
 0x751   :  { %v476_v2 = vmul.f32 0.9, %v453_v63  ;;  %640 = vmatpush.msrb.mxu0 %v38_v17 }
 0x753   :  { %641 = vmatpush.msrb.mxu0 %v37_v18 }
 0x755   :  { %642 = vmatpush.msrb.mxu0 %v36_v56 }
 0x7d2   :  { %v472_v0 = vpop.f32.mrf.mxu2 }
 0x7d3   :  { %v475_v1 = vadd.f32 %v472_v0, %v990_v21  ;;  %v50_v0 = vld [vmem:[%s1293_s2 + $0x80] sm:$0x1] }
 0x7d5   :  { %v477_v19 = vadd.f32 %v476_v2, %v475_v1  ;;  %v627_v1 = vmul.f32 19.0, %v50_v0 }
 0x7d7   :  { %v710_v20 = vadd.f32 -1.0, %v477_v19  ;;  %vm478_vm15 = vcmp.gt.f32.partialorder %v477_v19, 1.0  ;;  %v628_v2 = vperm.slane %v627_v1, 0 }
 0x7d8   :  { %v709_v23 = vsel %vm478_vm15, 1.0, %v756_v32  ;;  %711 = vmatmul.msk.f32.vlgmr.msrb.gmra.mxu3 %vm478_vm15, %v755_v22 }
 0x7d9   :  { %v483_v24 = vadd.f32 %v709_v23, %v454_v62  ;;  %v482_v25 = vsel %vm478_vm15, %v710_v20, %v477_v19 }
 0x7da   :  { %v505_v28 = vmul.f32 0.9, %v482_v25 }
 0x85b   :  { %v501_v26 = vpop.f32.mrf.mxu3 }
 0x85c   :  { %v504_v27 = vadd.f32 %v501_v26, %v990_v21 }
 0x85e   :  { %v506_v29 = vadd.f32 %v505_v28, %v504_v27 }
 0x860   :  { %v713_v30 = vadd.f32 -1.0, %v506_v29  ;;  %vm507_vm0 = vcmp.gt.f32.partialorder %v506_v29, 1.0 }
 0x861   :  { %v712_v31 = vsel %vm507_vm0, 1.0, %v756_v32  ;;  %714 = vmatmul.msk.f32.vlgmr.msra.gmra.mxu0 %vm507_vm0, %v755_v22 }
 0x862   :  { %v512_v33 = vadd.f32 %v712_v31, %v483_v24  ;;  %v511_v34 = vsel %vm507_vm0, %v713_v30, %v506_v29 }
 0x863   :  { %v534_v37 = vmul.f32 0.9, %v511_v34 }
 0x8de   :  { %v530_v35 = vpop.f32.mrf.mxu0 }
 0x8df   :  { %v533_v36 = vadd.f32 %v530_v35, %v990_v21 }
 0x8e1   :  { %v535_v38 = vadd.f32 %v534_v37, %v533_v36 }
 0x8e3   :  { %v716_v39 = vadd.f32 -1.0, %v535_v38  ;;  %vm536_vm1 = vcmp.gt.f32.partialorder %v535_v38, 1.0 }
 0x8e4   :  { %v715_v40 = vsel %vm536_vm1, 1.0, %v756_v32  ;;  %717 = vmatmul.msk.f32.vlgmr.msra.gmra.mxu1 %vm536_vm1, %v755_v22 }
 0x8e5   :  { %v541_v41 = vadd.f32 %v715_v40, %v512_v33  ;;  %v540_v42 = vsel %vm536_vm1, %v716_v39, %v535_v38 }
 0x8e6   :  { %v563_v45 = vmul.f32 0.9, %v540_v42 }
 0x961   :  { %v559_v43 = vpop.f32.mrf.mxu1 }
 0x962   :  { %v562_v44 = vadd.f32 %v559_v43, %v990_v21 }
 0x964   :  { %v564_v46 = vadd.f32 %v563_v45, %v562_v44 }
 0x966   :  { %v719_v47 = vadd.f32 -1.0, %v564_v46  ;;  %vm565_vm2 = vcmp.gt.f32.partialorder %v564_v46, 1.0 }
 0x967   :  { %v718_v48 = vsel %vm565_vm2, 1.0, %v756_v32  ;;  %720 = vmatmul.msk.f32.vlgmr.msra.gmra.mxu2 %vm565_vm2, %v755_v22 }
 0x968   :  { %v569_v49 = vsel %vm565_vm2, %v719_v47, %v564_v46  ;;  %v570_v50 = vadd.f32 %v718_v48, %v541_v41 }
 0x969   :  { %v592_v11 = vmul.f32 0.9, %v569_v49 }
 0x9ea   :  { %v588_v9 = vpop.f32.mrf.mxu2 }
 0x9eb   :  { %v591_v10 = vadd.f32 %v588_v9, %v990_v21 }
 0x9ed   :  { %v593_v12 = vadd.f32 %v592_v11, %v591_v10 }
 0x9ef   :  { %v722_v13 = vadd.f32 -1.0, %v593_v12  ;;  %vm594_vm3 = vcmp.gt.f32.partialorder %v593_v12, 1.0 }
 0x9f0   :  { %723 = vmatmul.msk.f32.vlgmr.msra.gmra.mxu3 %vm594_vm3, %v755_v22  ;;  %v721_v14 = vsel %vm594_vm3, 1.0, %v756_v32  ;;  %v35_v22 = vld [vmem:[%s1293_s2 + $0x8] sm:$0xff] }
 0x9f1   :  { %v598_v15 = vsel %vm594_vm3, %v722_v13, %v593_v12  ;;  %v599_v16 = vadd.f32 %v721_v14, %v570_v50  ;;  %643 = vmatpush.msrb.mxu0 %v35_v22 }
 0x9f2   :  { %v621_v60 = vmul.f32 0.9, %v598_v15 }
 0x9f3   :  { %644 = vmatpush.msrb.mxu0 %v34_v57 }
 0xa73   :  { %v617_v58 = vpop.f32.mrf.mxu3 }
 0xa74   :  { %v620_v59 = vadd.f32 %v617_v58, %v990_v21 }
 0xa76   :  { %v622_v61 = vadd.f32 %v621_v60, %v620_v59 }
 0xa78   :  { %vm623_vm4 = vcmp.gt.f32.partialorder %v622_v61, 1.0 }
 0xa79   :  { %v724_v62 = vsel %vm623_vm4, 1.0, %v756_v32 }
 0xa7a   :  { %v626_v63 = vadd.f32 %v724_v62, %v599_v16 }
 0xa7c   :  { %645 = vmatmul.f32.vlgmr.msrb.gmra.mxu0 %v626_v63 }
 0xaf9   :  { %v646_v21 = vpop.f32.mrf.mxu0 }
 0xafa   :  { %v647_v19 = vadd.f32 %v646_v21, %v628_v2 }
 0xafc   :  { %650 = vst.msk [vmem:[#allocation2] sm:$0xff] %vm649_vm5, %v647_v19 }
 0xafd   :  { %661 = dma.vmem_to_hbm [thread:$0]  %s657_s28, 128, %s659_s4, [#allocation3]  }
 0xafe   :  { %753 = dma.done.wait [#allocation3], 128  }
 0xaff   :  { %754 = vsyncadd [#allocation3], 4294967168 }
 0xb00   :  { %666 = vsyncpa [#allocation3], 1 }

</bundles_post_ra>
